<compile_context>
chip_gen: v7x
topology: tpu7x:2x2x1
jax: 0.10.0
libtpu: 0.0.40
codegen_flags: <defaults>
</compile_context>

<pallas_src>
from typing import NamedTuple

import jax
import jax.numpy as jnp
from jax.experimental import pallas as pl
from jax.experimental.pallas import tpu as pltpu


class RelaxedBernoulliParams(NamedTuple):
    logits: jax.Array       # [B, T, 1]
    temperature: jax.Array  # scalar (0.1)


def _gate_kernel(x_ref, w_ref, b_ref, m_ref, o_ref):
    # x_ref: (tR, D)   w_ref: (1, D)   b_ref: (1,) in SMEM
    # m_ref / o_ref: (1, tR) lane-dense
    x = x_ref[...].astype(jnp.float32)
    w = w_ref[...].astype(jnp.float32)
    # VPU multiply + XLU lane reduce; f32 accumulate.
    row = jnp.sum(x * w, axis=-1) + b_ref[0]                  # (tR,)
    o_ref[...] = (row[None, :] * m_ref[...]).astype(o_ref.dtype)


def _pick_row_tile(n_rows: int, d: int, itemsize: int) -> int:
    # Largest tile in {1024, 512, 256, 128} whose x block stays <= 8 MiB,
    # so 2x double-buffered input stays under v5e's 16 MiB default scoped
    # VMEM and far under v7x's 64 MiB physical VMEM.  Capped by the padded
    # row count so tiny inputs don't over-pad.
    budget = 8 * 1024 * 1024
    tile = 128
    for cand in (1024, 512, 256, 128):
        if cand * d * itemsize <= budget:
            tile = cand
            break
    n_round = ((n_rows + 127) // 128) * 128
    return min(tile, n_round)


def relaxed_bernoulli_gate(x, mask, weight, bias, temperature=0.1):
    """x: [B, T, D] (f32 or bf16), mask: [B, T], weight: [D, 1], bias: [1]
    -> RelaxedBernoulliParams(logits [B, T, 1], temperature)."""
    B, T, D = x.shape
    N = B * T
    itemsize = jnp.dtype(x.dtype).itemsize
    tR = _pick_row_tile(N, D, itemsize)
    num_tiles = (N + tR - 1) // tR
    N_pad = num_tiles * tR

    x_rows = x.reshape(N, D)
    mask_row = mask.reshape(1, N).astype(jnp.float32)   # cast once here
    if N_pad != N:
        x_rows = jnp.pad(x_rows, ((0, N_pad - N), (0, 0)))
        mask_row = jnp.pad(mask_row, ((0, 0), (0, N_pad - N)))
    w_row = weight.reshape(1, D)                          # lane-dense weight
    bias_s = bias.reshape(1).astype(jnp.float32)

    tile_bytes = tR * D * itemsize
    vmem_limit = min(96 * 1024 * 1024, max(16 * 1024 * 1024, 4 * tile_bytes))

    logits_row = pl.pallas_call(
        _gate_kernel,
        out_shape=jax.ShapeDtypeStruct((1, N_pad), jnp.float32),
        grid_spec=pltpu.PrefetchScalarGridSpec(
            num_scalar_prefetch=0,
            grid=(num_tiles,),
            in_specs=[
                pl.BlockSpec((tR, D), lambda i: (i, 0)),            # x row tile
                pl.BlockSpec((1, D), lambda i: (0, 0)),             # weight
                pl.BlockSpec(memory_space=pltpu.MemorySpace.SMEM),  # bias scalar
                pl.BlockSpec((1, tR), lambda i: (0, i)),            # mask (lane-dense)
            ],
            out_specs=pl.BlockSpec((1, tR), lambda i: (0, i)),      # logits (lane-dense)
        ),
        compiler_params=pltpu.CompilerParams(
            dimension_semantics=("parallel",),   # shards across 2 TCs on v7x
            vmem_limit_bytes=vmem_limit),
    )(x_rows, w_row, bias_s, mask_row)

    logits = logits_row[0, :N].reshape(B, T, 1)

    # TODO(synk): torch.distributions.RelaxedBernoulli has no Pallas
    # equivalent; return its defining parameters (logits, temperature).
    return RelaxedBernoulliParams(
        logits=logits,
        temperature=jnp.asarray(temperature, jnp.float32))


if __name__ == "__main__":
    B, T, D = 2, 8, 32
    key = jax.random.PRNGKey(0)
    kx, km, kw, kb = jax.random.split(key, 4)

    x = jax.random.normal(kx, (B, T, D), dtype=jnp.float32)
    # 0/1 padding-style mask
    mask = (jax.random.uniform(km, (B, T)) > 0.3).astype(jnp.float32)

    # Deterministic Linear(D, 1) init (PyTorch-style uniform(-1/sqrt(D), 1/sqrt(D)))
    bound = 1.0 / (D ** 0.5)
    weight = jax.random.uniform(kw, (D, 1), minval=-bound, maxval=bound,
                                dtype=jnp.float32)
    bias = jax.random.uniform(kb, (1,), minval=-bound, maxval=bound,
                              dtype=jnp.float32)

    dist = relaxed_bernoulli_gate(x, mask, weight, bias)
    jax.block_until_ready(dist.logits)

    # Pure-JAX reference check
    ref = ((x @ weight).squeeze(-1) + bias) * mask
    ref = ref[..., None]
    assert dist.logits.shape == (B, T, 1)
    assert jnp.allclose(dist.logits, ref, atol=1e-5, rtol=1e-5), "mismatch"
    assert float(dist.temperature) == 0.1 or jnp.isclose(dist.temperature, 0.1)

    print("KERNEL_OK")
</pallas_src>

<mosaic_0001>
module attributes {stable_mosaic.version = 11 : i64} {
  func.func @_gate_kernel(%arg0: i32, %arg1: memref<128x32xf32, #tpu.memory_space<vmem>>, %arg2: memref<1x32xf32, #tpu.memory_space<vmem>>, %arg3: memref<1xf32, #tpu.memory_space<smem>>, %arg4: memref<1x128xf32, #tpu.memory_space<vmem>>, %arg5: memref<1x128xf32, #tpu.memory_space<vmem>>) attributes {dimension_semantics = [#tpu.dimension_semantics<parallel>], iteration_bounds = array<i64: 1>, scalar_prefetch = 0 : i64, scratch_operands = 0 : i64, tpu.core_type = #tpu.core_type<tc>, window_params = [{transform_indices = @transform_0, window_bounds = array<i64: 128, 32>}, {pipeline_mode = #tpu.pipeline_mode<synchronous>, transform_indices = @transform_1, window_bounds = array<i64: 1, 32>}, {transform_indices = @transform_2, window_bounds = array<i64: 1>}, {transform_indices = @transform_3, window_bounds = array<i64: 1, 128>}, {transform_indices = @transform_4, window_bounds = array<i64: 1, 128>}]} {
    %c0 = arith.constant 0 : index
    %c0_0 = arith.constant 0 : index
    %0 = vector.load %arg1[%c0, %c0_0] : memref<128x32xf32, #tpu.memory_space<vmem>>, vector<128x32xf32>
    %c0_1 = arith.constant 0 : index
    %c0_2 = arith.constant 0 : index
    %1 = vector.load %arg2[%c0_1, %c0_2] : memref<1x32xf32, #tpu.memory_space<vmem>>, vector<1x32xf32>
    %2 = vector.broadcast %1 : vector<1x32xf32> to vector<128x32xf32>
    %3 = arith.mulf %0, %2 : vector<128x32xf32>
    %cst = arith.constant dense<0.000000e+00> : vector<128xf32>
    %4 = vector.multi_reduction <add>, %3, %cst [1] : vector<128x32xf32> to vector<128xf32>
    %c0_3 = arith.constant 0 : index
    %5 = memref.load %arg3[%c0_3] : memref<1xf32, #tpu.memory_space<smem>>
    %6 = vector.broadcast %5 : f32 to vector<128xf32>
    %7 = arith.addf %4, %6 : vector<128xf32>
    %8 = vector.shape_cast %7 : vector<128xf32> to vector<1x128xf32>
    %c0_4 = arith.constant 0 : index
    %c0_5 = arith.constant 0 : index
    %9 = vector.load %arg4[%c0_4, %c0_5] : memref<1x128xf32, #tpu.memory_space<vmem>>, vector<1x128xf32>
    %10 = arith.mulf %8, %9 : vector<1x128xf32>
    %c0_6 = arith.constant 0 : index
    %c0_7 = arith.constant 0 : index
    %11 = vector.load %arg5[%c0_6, %c0_7] : memref<1x128xf32, #tpu.memory_space<vmem>>, vector<1x128xf32>
    tpu.vector_store %arg5[%c0_6, %c0_7], %10 {strides = array<i32>} : memref<1x128xf32, #tpu.memory_space<vmem>>, vector<1x128xf32>,
    return
  }
  func.func @transform_0(%arg0: i32) -> (i32, i32) {
    %c0_i32 = arith.constant 0 : i32
    %c0_i32_0 = arith.constant 0 : i32
    return %arg0, %c0_i32 : i32, i32
  }
  func.func @transform_1(%arg0: i32) -> (i32, i32) {
    %c0_i32 = arith.constant 0 : i32
    %c0_i32_0 = arith.constant 0 : i32
    %c0_i32_1 = arith.constant 0 : i32
    return %c0_i32, %c0_i32_0 : i32, i32
  }
  func.func @transform_2(%arg0: i32) -> i32 {
    %c0_i32 = arith.constant 0 : i32
    %c0_i32_0 = arith.constant 0 : i32
    return %c0_i32 : i32
  }
  func.func @transform_3(%arg0: i32) -> (i32, i32) {
    %c0_i32 = arith.constant 0 : i32
    %c0_i32_0 = arith.constant 0 : i32
    return %c0_i32, %arg0 : i32, i32
  }
  func.func @transform_4(%arg0: i32) -> (i32, i32) {
    %c0_i32 = arith.constant 0 : i32
    %c0_i32_0 = arith.constant 0 : i32
    return %c0_i32, %arg0 : i32, i32
  }
}

</mosaic_0001>

<bundles_post_ra>
// kernel: tpu_custom_call.1
= control target key start
LH: loop header
LB: loop body
LE: loop exit
PB: predicated region body
PF: predicated region fallthrough
CT: control target
= control target key end

     0   :  { %vm58_vm0 = vcmask 261120   ;;  %s595_s0 = inlined_call_operand.vmem [shape: f32[128,32], index: 0, kind: input, shape index: {}]   ;;  %s596_s1 = inlined_call_operand.vmem [shape: f32[1,32], index: 1, kind: input, shape index: {}]   ;;  %s597_s2 = inlined_call_operand.<no memory space> [shape: f32[1], index: 2, kind: input, shape index: {}]   ;;  %s598_s3 = inlined_call_operand.vmem [shape: f32[1,128], index: 3, kind: input, shape index: {}]   ;;  %s599_s4 = inlined_call_operand.hbm [shape: f32[1,128], index: 4, kind: output, shape index: {}]  }
   0x1   :  { %v21_v0 = vld [vmem:[%s595_s0 + $0x10] sm:$0xff]  ;;  %v417_v1 = vld [vmem:[%s596_s1] ss:$0 sm:$0xff]  ;;  %v22_v5 = vld [vmem:[%s595_s0 + $0x18] sm:$0xff] }
   0x2   :  { %v19_v2 = vld [vmem:[%s595_s0] sm:$0xff]  ;;  %v44_v3 = vmul.f32 %v417_v1, %v21_v0  ;;  %v20_v6 = vld [vmem:[%s595_s0 + $0x8] sm:$0xff]  ;;  %v45_v7 = vmul.f32 %v417_v1, %v22_v5  ;;  %v26_v17 = vld [vmem:[%s595_s0 + $0x38] sm:$0xff] }
   0x3   :  { %v42_v4 = vmul.f32 %v417_v1, %v19_v2  ;;  %v43_v8 = vmul.f32 %v417_v1, %v20_v6  ;;  %v24_v9 = vld [vmem:[%s595_s0 + $0x28] sm:$0xff]  ;;  %v23_v10 = vld [vmem:[%s595_s0 + $0x20] sm:$0xff]  ;;  %v25_v18 = vld [vmem:[%s595_s0 + $0x30] sm:$0xff] }
   0x4   :  { %v65_v11 = vsel %vm58_vm0, %v44_v3, 0.0  ;;  %v68_v13 = vsel %vm58_vm0, %v45_v7, 0.0  ;;  %v47_v15 = vmul.f32 %v417_v1, %v24_v9  ;;  %v46_v16 = vmul.f32 %v417_v1, %v23_v10 }
   0x5   :  { %v59_v12 = vsel %vm58_vm0, %v42_v4, 0.0  ;;  %66 = vadd.xlane.f32.xlu1 %v65_v11  ;;  %v62_v14 = vsel %vm58_vm0, %v43_v8, 0.0 }
   0x6   :  { %60 = vadd.xlane.f32.xlu0 %v59_v12 }
   0x7   :  { %10 = vsyncpa [#allocation4], 0  ;;  %v74_v19 = vsel %vm58_vm0, %v47_v15, 0.0  ;;  %v71_v20 = vsel %vm58_vm0, %v46_v16, 0.0  ;;  %v49_v21 = vmul.f32 %v417_v1, %v26_v17  ;;  %v48_v22 = vmul.f32 %v417_v1, %v25_v18  ;;  %v28_v23 = vld [vmem:[%s595_s0 + $0x48] sm:$0xff]  ;;  %v27_v24 = vld [vmem:[%s595_s0 + $0x40] sm:$0xff] }
   0x8   :  { %v51_v27 = vmul.f32 %v417_v1, %v28_v23  ;;  %v50_v28 = vmul.f32 %v417_v1, %v27_v24  ;;  %v30_v29 = vld [vmem:[%s595_s0 + $0x58] sm:$0xff]  ;;  %v29_v30 = vld [vmem:[%s595_s0 + $0x50] sm:$0xff]  ;;  %v32_v35 = vld [vmem:[%s595_s0 + $0x68] sm:$0xff]  ;;  %v447_v50 = vmov 0   ;;  %v108_v3 = vstv %s597_s2  ;;  %s448_s2 = smov [#allocation3]  }
   0x9   :  { %69 = vadd.xlane.f32.xlu1 %v68_v13  ;;  %v80_v25 = vsel %vm58_vm0, %v49_v21, 0.0  ;;  %v77_v26 = vsel %vm58_vm0, %v48_v22, 0.0  ;;  %v53_v33 = vmul.f32 %v417_v1, %v30_v29  ;;  %v52_v34 = vmul.f32 %v417_v1, %v29_v30  ;;  %v31_v36 = vld [vmem:[%s595_s0 + $0x60] sm:$0xff]  ;;  %v34_v41 = vld [vmem:[%s595_s0 + $0x78] sm:$0xff]  ;;  %v33_v42 = vld [vmem:[%s595_s0 + $0x70] sm:$0xff]  ;;  %421 = vset.pattern.permute.xlu0 %v447_v50  ;;  %s409_s24 = sshll.u32 %s448_s2, 4  ;;  %s410_s24 = int_to_ptr.vmem [resolvable:$true] %s409_s24 }
   0xa   :  { %63 = vadd.xlane.f32.xlu0 %v62_v14  ;;  %v86_v31 = vsel %vm58_vm0, %v51_v27, 0.0  ;;  %v83_v32 = vsel %vm58_vm0, %v50_v28, 0.0  ;;  %v55_v39 = vmul.f32 %v417_v1, %v32_v35  ;;  %v54_v40 = vmul.f32 %v417_v1, %v31_v36  ;;  %v418_v49 = vld [vmem:[%s598_s3] ss:$0 sm:$0xff]  ;;  %422 = vset.pattern.permute.xlu1 %v447_v50  ;;  %s423_s25 = scalar_lea.vmem %s410_s24, 16  ;;  %s427_s26 = scalar_lea.vmem %s410_s24, 32 }
   0xb   :  { %v92_v37 = vsel %vm58_vm0, %v53_v33, 0.0  ;;  %v89_v38 = vsel %vm58_vm0, %v52_v34, 0.0  ;;  %v57_v45 = vmul.f32 %v417_v1, %v34_v41  ;;  %v56_v46 = vmul.f32 %v417_v1, %v33_v42  ;;  %p424_p0 = scmp.ne.s32.totalorder %s410_s24, %s423_s25  ;;  %p428_p1 = scmp.lt.s32.totalorder %s410_s24, %s410_s24 }
   0xc   :  { %v98_v43 = vsel %vm58_vm0, %v55_v39, 0.0  ;;  %v95_v44 = vsel %vm58_vm0, %v54_v40, 0.0  ;;  %vm301_vm1 = vcmask 130112   ;;  %vm308_vm2 = vcmask 195712   ;;  %p429_p2 = scmp.lt.s32.totalorder %s427_s26, %s423_s25 }
   0xd   :  { %75 = vadd.xlane.f32.xlu1 %v74_v19  ;;  %v104_v47 = vsel %vm58_vm0, %v57_v45, 0.0  ;;  %v101_v48 = vsel %vm58_vm0, %v56_v46, 0.0  ;;  %vm315_vm3 = vcmask 261312   ;;  %vm322_vm4 = vcmask 326912  }
   0xe   :  { %72 = vadd.xlane.f32.xlu0 %v71_v20  ;;  %vm329_vm5 = vcmask 392512   ;;  %vm336_vm6 = vcmask 458112   ;;  %vm343_vm7 = vcmask 523712   ;;  %vm350_vm8 = vcmask 589312   ;;  %p430_p3 = por %p429_p2, %p428_p1 }
   0xf   :  { %vm357_vm9 = vcmask 654912   ;;  %vm364_vm10 = vcmask 720512   ;;  %vm371_vm11 = vcmask 786112   ;;  %vm378_vm12 = vcmask 851712  }
  0x10   :  { %vm385_vm13 = vcmask 917312   ;;  %vm392_vm14 = vcmask 982912   ;;  %vm399_vm15 = vcmask 1048512   ;;  %p431_p4 = pnand %p430_p3, %p424_p0 }
  0x11   :  { %81 = vadd.xlane.f32.xlu1 %v80_v25 }
  0x12   :  { %78 = vadd.xlane.f32.xlu0 %v77_v26 }
  0x15   :  { %87 = vadd.xlane.f32.xlu1 %v86_v31 }
  0x16   :  { %84 = vadd.xlane.f32.xlu0 %v83_v32 }
  0x19   :  { %93 = vadd.xlane.f32.xlu1 %v92_v37 }
  0x1a   :  { %90 = vadd.xlane.f32.xlu0 %v89_v38 }
  0x1d   :  { %99 = vadd.xlane.f32.xlu1 %v98_v43 }
  0x1e   :  { %96 = vadd.xlane.f32.xlu0 %v95_v44 }
  0x21   :  { %105 = vadd.xlane.f32.xlu1 %v104_v47 }
  0x22   :  { %102 = vadd.xlane.f32.xlu0 %v101_v48 }
  0x32   :  { %136 = vbcast.lane.b32.xlu1 %v418_v49, 264 }
  0x36   :  { %140 = vbcast.lane.b32.xlu1 %v418_v49, 272 }
  0x38   :  { %132 = vbcast.lane.b32.xlu0 %v418_v49, 256 }
  0x3a   :  { %144 = vbcast.lane.b32.xlu1 %v418_v49, 280 }
  0x3c   :  { %148 = vbcast.lane.b32.xlu0 %v418_v49, 288 }
  0x3e   :  { %152 = vbcast.lane.b32.xlu1 %v418_v49, 296 }
  0x40   :  { %156 = vbcast.lane.b32.xlu0 %v418_v49, 304 }
  0x42   :  { %160 = vbcast.lane.b32.xlu1 %v418_v49, 312 }
  0x44   :  { %164 = vbcast.lane.b32.xlu0 %v418_v49, 320 }
  0x46   :  { %168 = vbcast.lane.b32.xlu1 %v418_v49, 328 }
  0x48   :  { %172 = vbcast.lane.b32.xlu0 %v418_v49, 336 }
  0x4a   :  { %176 = vbcast.lane.b32.xlu1 %v418_v49, 344 }
  0x4c   :  { %180 = vbcast.lane.b32.xlu0 %v418_v49, 352 }
  0x4e   :  { %184 = vbcast.lane.b32.xlu1 %v418_v49, 360 }
  0x50   :  { %188 = vbcast.lane.b32.xlu0 %v418_v49, 368 }
  0x52   :  { %192 = vbcast.lane.b32.xlu1 %v418_v49, 376 }
  0x92   :  { %v67_v51 = vpop.xlane.xlu1 %66 }
  0x93   :  { %v61_v52 = vpop.xlane.xlu0 %60  ;;  %v111_v10 = vadd.f32 %v108_v3, %v67_v51 }
  0x94   :  { %v109_v4 = vadd.f32 %v108_v3, %v61_v52  ;;  %v290_v52 = vlaneseq }
  0x96   :  { %v70_v53 = vpop.xlane.xlu1 %69 }
  0x97   :  { %v64_v54 = vpop.xlane.xlu0 %63  ;;  %v112_v14 = vadd.f32 %v108_v3, %v70_v53  ;;  %v547_v53 = vand.u32 127, %v290_v52 }
  0x98   :  { %v110_v5 = vadd.f32 %v108_v3, %v64_v54  ;;  %v549_v54 = vshrl.u32 %v290_v52, 7 }
  0x9a   :  { %v76_v55 = vpop.xlane.xlu1 %75 }
  0x9b   :  { %v73_v56 = vpop.xlane.xlu0 %72  ;;  %v114_v20 = vadd.f32 %v108_v3, %v76_v55  ;;  %v296_v55 = vadd.s32 4294967288, %v547_v53 }
  0x9c   :  { %v113_v15 = vadd.f32 %v108_v3, %v73_v56  ;;  %v303_v56 = vadd.s32 4294967280, %v547_v53 }
  0x9e   :  { %v82_v57 = vpop.xlane.xlu1 %81 }
  0x9f   :  { %v79_v58 = vpop.xlane.xlu0 %78  ;;  %v116_v26 = vadd.f32 %v108_v3, %v82_v57 }
  0xa0   :  { %v115_v21 = vadd.f32 %v108_v3, %v79_v58  ;;  %v299_v58 = vsub.s32 %v296_v55, %v549_v54  ;;  %v394_v55 = vadd.s32 4294967176, %v547_v53 }
  0xa2   :  { %v88_v59 = vpop.xlane.xlu1 %87 }
  0xa3   :  { %v85_v60 = vpop.xlane.xlu0 %84  ;;  %v118_v32 = vadd.f32 %v108_v3, %v88_v59  ;;  %v294_v59 = vsub.s32 %v547_v53, %v549_v54 }
  0xa4   :  { %v117_v27 = vadd.f32 %v108_v3, %v85_v60  ;;  %v310_v60 = vadd.s32 4294967272, %v547_v53 }
  0xa6   :  { %v94_v61 = vpop.xlane.xlu1 %93 }
  0xa7   :  { %v91_v62 = vpop.xlane.xlu0 %90  ;;  %v120_v38 = vadd.f32 %v108_v3, %v94_v61 }
  0xa8   :  { %v119_v33 = vadd.f32 %v108_v3, %v91_v62  ;;  %v306_v62 = vsub.s32 %v303_v56, %v549_v54 }
  0xaa   :  { %v100_v63 = vpop.xlane.xlu1 %99 }
  0xab   :  { %v97_v0 = vpop.xlane.xlu0 %96  ;;  %v122_v44 = vadd.f32 %v108_v3, %v100_v63  ;;  %v317_v63 = vadd.s32 4294967264, %v547_v53 }
  0xac   :  { %v121_v39 = vadd.f32 %v108_v3, %v97_v0 }
  0xae   :  { %v106_v1 = vpop.xlane.xlu1 %105 }
  0xaf   :  { %v103_v2 = vpop.xlane.xlu0 %102  ;;  %v124_v49 = vadd.f32 %v108_v3, %v106_v1 }
  0xb0   :  { %v123_v45 = vadd.f32 %v108_v3, %v103_v2  ;;  %v313_v3 = vsub.s32 %v310_v60, %v549_v54 }
  0xb2   :  { %v137_v6 = vpop.permute.xlu1 %136 }
  0xb3   :  { %v133_v7 = vpop.permute.xlu0 %132  ;;  %v211_v8 = vmul.f32 %v137_v6, %v110_v5  ;;  %v320_v6 = vsub.s32 %v317_v63, %v549_v54  ;;  %v397_v63 = vsub.s32 %v394_v55, %v549_v54 }
  0xb4   :  { %v210_v9 = vmul.f32 %v133_v7, %v109_v4  ;;  %v324_v4 = vadd.s32 4294967256, %v547_v53  ;;  %v331_v7 = vadd.s32 4294967248, %v547_v53 }
  0xb5   :  { %246 = vperm.xlu1 %422, %v211_v8  }
  0xb6   :  { %243 = vperm.xlu0 %421, %v210_v9   ;;  %v141_v11 = vpop.permute.xlu1 %140 }
  0xb7   :  { %v149_v12 = vpop.permute.xlu0 %148  ;;  %v212_v13 = vmul.f32 %v141_v11, %v111_v10 }
  0xb8   :  { %v214_v18 = vmul.f32 %v149_v12, %v113_v15  ;;  %v327_v12 = vsub.s32 %v324_v4, %v549_v54 }
  0xb9   :  { %249 = vperm.xlu1 %422, %v212_v13   ;;  %v338_v13 = vadd.s32 4294967240, %v547_v53 }
  0xba   :  { %v145_v16 = vpop.permute.xlu1 %144 }
  0xbb   :  { %v157_v17 = vpop.permute.xlu0 %156  ;;  %v213_v19 = vmul.f32 %v145_v16, %v112_v14  ;;  %v334_v16 = vsub.s32 %v331_v7, %v549_v54 }
  0xbc   :  { %v216_v24 = vmul.f32 %v157_v17, %v115_v21  ;;  %v345_v17 = vadd.s32 4294967232, %v547_v53 }
  0xbd   :  { %252 = vperm.xlu0 %421, %v213_v19   ;;  %255 = vperm.xlu1 %422, %v214_v18  }
  0xbe   :  { %v153_v22 = vpop.permute.xlu1 %152 }
  0xbf   :  { %v165_v23 = vpop.permute.xlu0 %164  ;;  %v215_v25 = vmul.f32 %v153_v22, %v114_v20  ;;  %v341_v22 = vsub.s32 %v338_v13, %v549_v54 }
  0xc0   :  { %v218_v30 = vmul.f32 %v165_v23, %v117_v27  ;;  %v352_v23 = vadd.s32 4294967224, %v547_v53  ;;  %v359_v27 = vadd.s32 4294967216, %v547_v53 }
  0xc1   :  { %258 = vperm.xlu0 %421, %v215_v25   ;;  %261 = vperm.xlu1 %422, %v216_v24  }
  0xc2   :  { %v161_v28 = vpop.permute.xlu1 %160 }
  0xc3   :  { %v173_v29 = vpop.permute.xlu0 %172  ;;  %v217_v31 = vmul.f32 %v161_v28, %v116_v26  ;;  %v348_v26 = vsub.s32 %v345_v17, %v549_v54 }
  0xc4   :  { %v220_v36 = vmul.f32 %v173_v29, %v119_v33  ;;  %v366_v33 = vadd.s32 4294967208, %v547_v53 }
  0xc5   :  { %264 = vperm.xlu0 %421, %v217_v31   ;;  %267 = vperm.xlu1 %422, %v218_v30  }
  0xc6   :  { %v169_v34 = vpop.permute.xlu1 %168 }
  0xc7   :  { %v181_v35 = vpop.permute.xlu0 %180  ;;  %v219_v37 = vmul.f32 %v169_v34, %v118_v32  ;;  %v355_v32 = vsub.s32 %v352_v23, %v549_v54 }
  0xc8   :  { %v222_v41 = vmul.f32 %v181_v35, %v121_v39 }
  0xc9   :  { %270 = vperm.xlu0 %421, %v219_v37   ;;  %273 = vperm.xlu1 %422, %v220_v36   ;;  %v362_v36 = vsub.s32 %v359_v27, %v549_v54  ;;  %v373_v37 = vadd.s32 4294967200, %v547_v53 }
  0xca   :  { %v177_v40 = vpop.permute.xlu1 %176 }
  0xcb   :  { %v221_v42 = vmul.f32 %v177_v40, %v120_v38  ;;  %v189_v43 = vpop.permute.xlu0 %188 }
  0xcc   :  { %v224_v47 = vmul.f32 %v189_v43, %v123_v45  ;;  %v380_v43 = vadd.s32 4294967192, %v547_v53 }
  0xcd   :  { %276 = vperm.xlu0 %421, %v221_v42   ;;  %279 = vperm.xlu1 %422, %v222_v41   ;;  %v369_v42 = vsub.s32 %v366_v33, %v549_v54 }
  0xce   :  { %v185_v46 = vpop.permute.xlu1 %184  ;;  %v383_v52 = vsub.s32 %v380_v43, %v549_v54 }
  0xcf   :  { %v223_v48 = vmul.f32 %v185_v46, %v122_v44  ;;  %v376_v46 = vsub.s32 %v373_v37, %v549_v54 }
  0xd1   :  { %282 = vperm.xlu0 %421, %v223_v48   ;;  %285 = vperm.xlu1 %422, %v224_v47   ;;  %v387_v47 = vadd.s32 4294967184, %v547_v53 }
  0xd2   :  { %v193_v50 = vpop.permute.xlu1 %192 }
  0xd3   :  { %v225_v51 = vmul.f32 %v193_v50, %v124_v49 }
  0xd5   :  { %288 = vperm.xlu0 %421, %v225_v51  }
 0x134   :  { %v247_v57 = vpop.permute.xlu1 %246 }
 0x135   :  { %v244_v61 = vpop.permute.xlu0 %243  ;;  %v300_v1 = vrot.slane %v247_v57, %v299_v58  ;;  %v390_v58 = vsub.s32 %v387_v47, %v549_v54 }
 0x136   :  { %v295_v2 = vrot.slane %v244_v61, %v294_v59 }
 0x138   :  { %v250_v0 = vpop.permute.xlu1 %249  ;;  %v302_v10 = vsel %vm301_vm1, %v300_v1, %v295_v2 }
 0x139   :  { %v307_v5 = vrot.slane %v250_v0, %v306_v62 }
 0x13b   :  { %v309_v14 = vsel %vm308_vm2, %v307_v5, %v302_v10 }
 0x13c   :  { %v256_v8 = vpop.permute.xlu1 %255  ;;  %v253_v9 = vpop.permute.xlu0 %252 }
 0x13d   :  { %v314_v11 = vrot.slane %v253_v9, %v313_v3  ;;  %v321_v15 = vrot.slane %v256_v8, %v320_v6 }
 0x13f   :  { %v316_v18 = vsel %vm315_vm3, %v314_v11, %v309_v14 }
 0x140   :  { %v262_v19 = vpop.permute.xlu1 %261  ;;  %v259_v20 = vpop.permute.xlu0 %258  ;;  %v323_v25 = vsel %vm322_vm4, %v321_v15, %v316_v18 }
 0x141   :  { %v328_v21 = vrot.slane %v259_v20, %v327_v12  ;;  %v335_v24 = vrot.slane %v262_v19, %v334_v16 }
 0x143   :  { %v330_v28 = vsel %vm329_vm5, %v328_v21, %v323_v25 }
 0x144   :  { %v268_v29 = vpop.permute.xlu1 %267  ;;  %v265_v30 = vpop.permute.xlu0 %264  ;;  %v337_v35 = vsel %vm336_vm6, %v335_v24, %v330_v28 }
 0x145   :  { %v342_v31 = vrot.slane %v265_v30, %v341_v22  ;;  %v349_v34 = vrot.slane %v268_v29, %v348_v26 }
 0x147   :  { %v344_v38 = vsel %vm343_vm7, %v342_v31, %v337_v35 }
 0x148   :  { %v274_v39 = vpop.permute.xlu1 %273  ;;  %v271_v40 = vpop.permute.xlu0 %270  ;;  %v351_v45 = vsel %vm350_vm8, %v349_v34, %v344_v38 }
 0x149   :  { %v356_v41 = vrot.slane %v271_v40, %v355_v32  ;;  %v363_v44 = vrot.slane %v274_v39, %v362_v36 }
 0x14b   :  { %v358_v48 = vsel %vm357_vm9, %v356_v41, %v351_v45 }
 0x14c   :  { %v280_v49 = vpop.permute.xlu1 %279  ;;  %v277_v50 = vpop.permute.xlu0 %276  ;;  %v365_v57 = vsel %vm364_vm10, %v363_v44, %v358_v48 }
 0x14d   :  { %v370_v51 = vrot.slane %v277_v50, %v369_v42  ;;  %v377_v56 = vrot.slane %v280_v49, %v376_v46 }
 0x14f   :  { %v372_v59 = vsel %vm371_vm11, %v370_v51, %v365_v57 }
 0x150   :  { %v286_v60 = vpop.permute.xlu1 %285  ;;  %v283_v61 = vpop.permute.xlu0 %282  ;;  %v379_v1 = vsel %vm378_vm12, %v377_v56, %v372_v59 }
 0x151   :  { %v384_v62 = vrot.slane %v283_v61, %v383_v52  ;;  %v391_v0 = vrot.slane %v286_v60, %v390_v58 }
 0x153   :  { %v386_v2 = vsel %vm385_vm13, %v384_v62, %v379_v1 }
 0x154   :  { %v289_v3 = vpop.permute.xlu0 %288  ;;  %v393_v4 = vsel %vm392_vm14, %v391_v0, %v386_v2 }
 0x155   :  { %v398_v53 = vrot.slane %v289_v3, %v397_v63 }
 0x157   :  { %v400_v5 = vsel %vm399_vm15, %v398_v53, %v393_v4 }
 0x158   :  { %402 = vst [vmem:[#allocation3] sm:$0x1] %v400_v5 }
 0x159   :  { %434 = shalt.err (!%p431_p4)
}
 0x15a   :  { %s435_s28 = scalar_lea.hbm %s599_s4, 16 }
 0x15b   :  { %p436_p5 = scmp.ne.s32.totalorder %s599_s4, %s435_s28  ;;  %p439_p6 = scmp.lt.u32.totalorder %s435_s28, %s599_s4 }
 0x15d   :  { %p441_p7 = pnand %p439_p6, %p436_p5 }
 0x15f   :  { %444 = shalt.err (!%p441_p7)
}
 0x160   :  { %412 = dma.vmem_to_hbm [thread:$0]  %s410_s24, 16, %s599_s4, [#allocation4]  }
 0x161   :  { %445 = dma.done.wait [#allocation4], 16  }
 0x162   :  { %446 = vsyncadd [#allocation4], 4294967280 }
 0x163   :  { %416 = vsyncpa [#allocation4], 1 }

</bundles_post_ra>
